<compile_context>
chip_gen: v7x
topology: tpu7x:2x2x1
jax: 0.10.0
libtpu: 0.0.40
codegen_flags: <defaults>
</compile_context>

<pallas_src>
import jax
import jax.numpy as jnp
from jax.experimental import pallas as pl
from jax.experimental.pallas import tpu as pltpu

INPUT_SIZE = 784
HIDDEN_SIZE = 500
HIDDEN_SIZE2 = 100
NUM_CLASSES = 10

# lane-padded sizes (multiples of 128)
H1_PAD = 512
H2_PAD = 128
C_PAD = 128


def mlp_kernel(x_ref, w1_ref, b1_ref, w2_ref, b2_ref, w3_ref, b3_ref, o_ref):
    # fc1 + tanh  (bf16 operands -> f32 accumulate, activations in f32)
    h1 = jnp.dot(x_ref[...], w1_ref[...], preferred_element_type=jnp.float32)
    h1 = jnp.tanh(h1 + b1_ref[...])
    # fc2 + sigmoid
    h2 = jnp.dot(h1.astype(jnp.bfloat16), w2_ref[...],
                 preferred_element_type=jnp.float32)
    h2 = jax.nn.sigmoid(h2 + b2_ref[...])
    # fc3
    logits = jnp.dot(h2.astype(jnp.bfloat16), w3_ref[...],
                     preferred_element_type=jnp.float32)
    logits = logits + b3_ref[...]
    # Softmax exactly as in the reference module: exp(x) / exp(x).sum(1)
    # (no max-shift; padded classes carry b3=-1e30 so exp underflows to 0).
    e = jnp.exp(logits)
    denom = jnp.sum(e, axis=1, keepdims=True)
    o_ref[...] = (e * pl.reciprocal(denom, approx=True)).astype(o_ref.dtype)


def neural_net_forward(x, params):
    w1, b1, w2, b2, w3, b3 = params
    B = x.shape[0]

    # --- pad feature dims to lane multiples, cast MXU operands to bf16 ---
    w1p = jnp.pad(w1, ((0, 0), (0, H1_PAD - HIDDEN_SIZE))).astype(jnp.bfloat16)
    b1p = jnp.pad(b1, ((0, 0), (0, H1_PAD - HIDDEN_SIZE))).astype(jnp.float32)
    w2p = jnp.pad(w2, ((0, H1_PAD - HIDDEN_SIZE),
                       (0, H2_PAD - HIDDEN_SIZE2))).astype(jnp.bfloat16)
    b2p = jnp.pad(b2, ((0, 0), (0, H2_PAD - HIDDEN_SIZE2))).astype(jnp.float32)
    # zero rows for padded hidden2 units (they are sigmoid(0)=0.5) and
    # -1e30 bias on padded output lanes so they softmax to ~0.
    w3p = jnp.pad(w3, ((0, H2_PAD - HIDDEN_SIZE2),
                       (0, C_PAD - NUM_CLASSES))).astype(jnp.bfloat16)
    b3p = jnp.pad(b3, ((0, 0), (0, C_PAD - NUM_CLASSES)),
                  constant_values=-1e30).astype(jnp.float32)

    # --- batch tiling ---
    tile_b = min(256, max(8, ((B + 7) // 8) * 8))
    b_pad = ((B + tile_b - 1) // tile_b) * tile_b
    xp = jnp.pad(x, ((0, b_pad - B), (0, 0))).astype(jnp.bfloat16)
    grid = (b_pad // tile_b,)

    out = pl.pallas_call(
        mlp_kernel,
        out_shape=jax.ShapeDtypeStruct((b_pad, C_PAD), jnp.float32),
        grid_spec=pltpu.PrefetchScalarGridSpec(
            num_scalar_prefetch=0,
            grid=grid,
            in_specs=[
                pl.BlockSpec((tile_b, INPUT_SIZE), lambda i: (i, 0)),
                pl.BlockSpec((INPUT_SIZE, H1_PAD), lambda i: (0, 0)),
                pl.BlockSpec((1, H1_PAD), lambda i: (0, 0)),
                pl.BlockSpec((H1_PAD, H2_PAD), lambda i: (0, 0)),
                pl.BlockSpec((1, H2_PAD), lambda i: (0, 0)),
                pl.BlockSpec((H2_PAD, C_PAD), lambda i: (0, 0)),
                pl.BlockSpec((1, C_PAD), lambda i: (0, 0)),
            ],
            out_specs=pl.BlockSpec((tile_b, C_PAD), lambda i: (i, 0)),
        ),
        compiler_params=pltpu.CompilerParams(
            dimension_semantics=("parallel",),
            vmem_limit_bytes=32 * 1024 * 1024,
        ),
    )(xp, w1p, b1p, w2p, b2p, w3p, b3p)

    return out[:B, :NUM_CLASSES]


def xavier_uniform(key, fan_in, fan_out):
    # matches torch.nn.init.xavier_uniform_ (gain=1) on a [out, in] weight;
    # returned already transposed to [in, out].
    limit = (6.0 / (fan_in + fan_out)) ** 0.5
    w = jax.random.uniform(key, (fan_out, fan_in), jnp.float32, -limit, limit)
    return w.T


def init_params(key):
    k1, k2, k3 = jax.random.split(key, 3)
    w1 = xavier_uniform(k1, INPUT_SIZE, HIDDEN_SIZE)
    b1 = jnp.zeros((1, HIDDEN_SIZE), jnp.float32)
    w2 = xavier_uniform(k2, HIDDEN_SIZE, HIDDEN_SIZE2)
    b2 = jnp.zeros((1, HIDDEN_SIZE2), jnp.float32)
    w3 = xavier_uniform(k3, HIDDEN_SIZE2, NUM_CLASSES)
    b3 = jnp.zeros((1, NUM_CLASSES), jnp.float32)
    return (w1, b1, w2, b2, w3, b3)


def reference_forward(x, params):
    w1, b1, w2, b2, w3, b3 = params
    h1 = jnp.tanh(x @ w1 + b1)
    h2 = jax.nn.sigmoid(h1 @ w2 + b2)
    logits = h2 @ w3 + b3
    e = jnp.exp(logits)
    return e / jnp.sum(e, axis=1, keepdims=True)


if __name__ == "__main__":
    key = jax.random.PRNGKey(0)
    pkey, xkey = jax.random.split(key)
    params = init_params(pkey)

    B = 8
    x = jax.random.normal(xkey, (B, INPUT_SIZE), jnp.float32)

    out = neural_net_forward(x, params)
    out = jax.block_until_ready(out)

    ref = reference_forward(x, params)

    assert out.shape == (B, NUM_CLASSES)
    # softmax rows sum to ~1 (tolerance covers bf16 weights + approx reciprocal)
    row_sums = jnp.sum(out, axis=1)
    assert bool(jnp.all(jnp.abs(row_sums - 1.0) < 1e-2)), row_sums
    # matches pure-f32 reference within bf16 accuracy
    assert bool(jnp.allclose(out, ref, atol=2e-2, rtol=2e-2))

    print("KERNEL_OK")
</pallas_src>

<mosaic_0001>
module attributes {stable_mosaic.version = 11 : i64} {
  func.func @mlp_kernel(%arg0: i32, %arg1: memref<8x784xbf16, #tpu.memory_space<vmem>>, %arg2: memref<784x512xbf16, #tpu.memory_space<vmem>>, %arg3: memref<1x512xf32, #tpu.memory_space<vmem>>, %arg4: memref<512x128xbf16, #tpu.memory_space<vmem>>, %arg5: memref<1x128xf32, #tpu.memory_space<vmem>>, %arg6: memref<128x128xbf16, #tpu.memory_space<vmem>>, %arg7: memref<1x128xf32, #tpu.memory_space<vmem>>, %arg8: memref<8x128xf32, #tpu.memory_space<vmem>>) attributes {dimension_semantics = [#tpu.dimension_semantics<parallel>], iteration_bounds = array<i64: 1>, scalar_prefetch = 0 : i64, scratch_operands = 0 : i64, tpu.core_type = #tpu.core_type<tc>, window_params = [{transform_indices = @transform_0, window_bounds = array<i64: 8, 784>}, {pipeline_mode = #tpu.pipeline_mode<synchronous>, transform_indices = @transform_1, window_bounds = array<i64: 784, 512>}, {pipeline_mode = #tpu.pipeline_mode<synchronous>, transform_indices = @transform_2, window_bounds = array<i64: 1, 512>}, {pipeline_mode = #tpu.pipeline_mode<synchronous>, transform_indices = @transform_3, window_bounds = array<i64: 512, 128>}, {pipeline_mode = #tpu.pipeline_mode<synchronous>, transform_indices = @transform_4, window_bounds = array<i64: 1, 128>}, {pipeline_mode = #tpu.pipeline_mode<synchronous>, transform_indices = @transform_5, window_bounds = array<i64: 128, 128>}, {pipeline_mode = #tpu.pipeline_mode<synchronous>, transform_indices = @transform_6, window_bounds = array<i64: 1, 128>}, {transform_indices = @transform_7, window_bounds = array<i64: 8, 128>}]} {
    %c0 = arith.constant 0 : index
    %c0_0 = arith.constant 0 : index
    %0 = vector.load %arg1[%c0, %c0_0] : memref<8x784xbf16, #tpu.memory_space<vmem>>, vector<8x784xbf16>
    %c0_1 = arith.constant 0 : index
    %c0_2 = arith.constant 0 : index
    %1 = vector.load %arg2[%c0_1, %c0_2] : memref<784x512xbf16, #tpu.memory_space<vmem>>, vector<784x512xbf16>
    %cst = arith.constant dense<0.000000e+00> : vector<8x512xf32>
    %2 = tpu.matmul %0, %1, %cst {dimension_numbers = #tpu.dot_dimension_numbers<[1], [0], [0], [1], [0, 0, 1, 1], [], []>} : vector<8x784xbf16>, vector<784x512xbf16>, vector<8x512xf32> -> vector<8x512xf32>
    %c0_3 = arith.constant 0 : index
    %c0_4 = arith.constant 0 : index
    %3 = vector.load %arg3[%c0_3, %c0_4] : memref<1x512xf32, #tpu.memory_space<vmem>>, vector<1x512xf32>
    %4 = vector.broadcast %3 : vector<1x512xf32> to vector<8x512xf32>
    %5 = arith.addf %2, %4 : vector<8x512xf32>
    %6 = math.tanh %5 : vector<8x512xf32>
    %7 = arith.truncf %6 : vector<8x512xf32> to vector<8x512xbf16>
    %c0_5 = arith.constant 0 : index
    %c0_6 = arith.constant 0 : index
    %8 = vector.load %arg4[%c0_5, %c0_6] : memref<512x128xbf16, #tpu.memory_space<vmem>>, vector<512x128xbf16>
    %cst_7 = arith.constant dense<0.000000e+00> : vector<8x128xf32>
    %9 = tpu.matmul %7, %8, %cst_7 {dimension_numbers = #tpu.dot_dimension_numbers<[1], [0], [0], [1], [0, 0, 1, 1], [], []>} : vector<8x512xbf16>, vector<512x128xbf16>, vector<8x128xf32> -> vector<8x128xf32>
    %c0_8 = arith.constant 0 : index
    %c0_9 = arith.constant 0 : index
    %10 = vector.load %arg5[%c0_8, %c0_9] : memref<1x128xf32, #tpu.memory_space<vmem>>, vector<1x128xf32>
    %11 = vector.broadcast %10 : vector<1x128xf32> to vector<8x128xf32>
    %12 = arith.addf %9, %11 : vector<8x128xf32>
    %13 = arith.negf %12 : vector<8x128xf32>
    %14 = math.exp %13 : vector<8x128xf32>
    %cst_10 = arith.constant 1.000000e+00 : f32
    %15 = vector.broadcast %cst_10 : f32 to vector<8x128xf32>
    %16 = arith.addf %15, %14 : vector<8x128xf32>
    %17 = arith.divf %15, %16 : vector<8x128xf32>
    %18 = arith.truncf %17 : vector<8x128xf32> to vector<8x128xbf16>
    %c0_11 = arith.constant 0 : index
    %c0_12 = arith.constant 0 : index
    %19 = vector.load %arg6[%c0_11, %c0_12] : memref<128x128xbf16, #tpu.memory_space<vmem>>, vector<128x128xbf16>
    %cst_13 = arith.constant dense<0.000000e+00> : vector<8x128xf32>
    %20 = tpu.matmul %18, %19, %cst_13 {dimension_numbers = #tpu.dot_dimension_numbers<[1], [0], [0], [1], [0, 0, 1, 1], [], []>} : vector<8x128xbf16>, vector<128x128xbf16>, vector<8x128xf32> -> vector<8x128xf32>
    %c0_14 = arith.constant 0 : index
    %c0_15 = arith.constant 0 : index
    %21 = vector.load %arg7[%c0_14, %c0_15] : memref<1x128xf32, #tpu.memory_space<vmem>>, vector<1x128xf32>
    %22 = vector.broadcast %21 : vector<1x128xf32> to vector<8x128xf32>
    %23 = arith.addf %20, %22 : vector<8x128xf32>
    %24 = math.exp %23 : vector<8x128xf32>
    %cst_16 = arith.constant dense<0.000000e+00> : vector<8xf32>
    %25 = vector.multi_reduction <add>, %24, %cst_16 [1] : vector<8x128xf32> to vector<8xf32>
    %26 = vector.shape_cast %25 : vector<8xf32> to vector<8x1xf32>
    %27 = tpu.reciprocal %26 {approx = true} : vector<8x1xf32> -> vector<8x1xf32>
    %28 = vector.broadcast %27 : vector<8x1xf32> to vector<8x128xf32>
    %29 = arith.mulf %24, %28 : vector<8x128xf32>
    %c0_17 = arith.constant 0 : index
    %c0_18 = arith.constant 0 : index
    %30 = vector.load %arg8[%c0_17, %c0_18] : memref<8x128xf32, #tpu.memory_space<vmem>>, vector<8x128xf32>
    tpu.vector_store %arg8[%c0_17, %c0_18], %29 {strides = array<i32>} : memref<8x128xf32, #tpu.memory_space<vmem>>, vector<8x128xf32>,
    return
  }
  func.func @transform_0(%arg0: i32) -> (i32, i32) {
    %c0_i32 = arith.constant 0 : i32
    %c0_i32_0 = arith.constant 0 : i32
    return %arg0, %c0_i32 : i32, i32
  }
  func.func @transform_1(%arg0: i32) -> (i32, i32) {
    %c0_i32 = arith.constant 0 : i32
    %c0_i32_0 = arith.constant 0 : i32
    %c0_i32_1 = arith.constant 0 : i32
    return %c0_i32, %c0_i32_0 : i32, i32
  }
  func.func @transform_2(%arg0: i32) -> (i32, i32) {
    %c0_i32 = arith.constant 0 : i32
    %c0_i32_0 = arith.constant 0 : i32
    %c0_i32_1 = arith.constant 0 : i32
    return %c0_i32, %c0_i32_0 : i32, i32
  }
  func.func @transform_3(%arg0: i32) -> (i32, i32) {
    %c0_i32 = arith.constant 0 : i32
    %c0_i32_0 = arith.constant 0 : i32
    %c0_i32_1 = arith.constant 0 : i32
    return %c0_i32, %c0_i32_0 : i32, i32
  }
  func.func @transform_4(%arg0: i32) -> (i32, i32) {
    %c0_i32 = arith.constant 0 : i32
    %c0_i32_0 = arith.constant 0 : i32
    %c0_i32_1 = arith.constant 0 : i32
    return %c0_i32, %c0_i32_0 : i32, i32
  }
  func.func @transform_5(%arg0: i32) -> (i32, i32) {
    %c0_i32 = arith.constant 0 : i32
    %c0_i32_0 = arith.constant 0 : i32
    %c0_i32_1 = arith.constant 0 : i32
    return %c0_i32, %c0_i32_0 : i32, i32
  }
  func.func @transform_6(%arg0: i32) -> (i32, i32) {
    %c0_i32 = arith.constant 0 : i32
    %c0_i32_0 = arith.constant 0 : i32
    %c0_i32_1 = arith.constant 0 : i32
    return %c0_i32, %c0_i32_0 : i32, i32
  }
  func.func @transform_7(%arg0: i32) -> (i32, i32) {
    %c0_i32 = arith.constant 0 : i32
    %c0_i32_0 = arith.constant 0 : i32
    return %arg0, %c0_i32 : i32, i32
  }
}

</mosaic_0001>

<bundles_post_ra>
// kernel: tpu_custom_call.1
= control target key start
LH: loop header
LB: loop body
LE: loop exit
PB: predicated region body
PF: predicated region fallthrough
CT: control target
= control target key end

     0   :  { %12 = vsyncpa [#allocation3], 0  ;;  %s3110_s0 = inlined_call_operand.hbm [shape: bf16[8,784], index: 0, kind: input, shape index: {}]   ;;  %s3111_s1 = inlined_call_operand.hbm [shape: bf16[784,512], index: 1, kind: input, shape index: {}]   ;;  %s3112_s2 = inlined_call_operand.vmem [shape: f32[1,512], index: 2, kind: input, shape index: {}]   ;;  %s3113_s3 = inlined_call_operand.hbm [shape: bf16[512,128], index: 3, kind: input, shape index: {}]   ;;  %s3114_s4 = inlined_call_operand.vmem [shape: f32[1,128], index: 4, kind: input, shape index: {}]   ;;  %s3115_s5 = inlined_call_operand.hbm [shape: bf16[128,128], index: 5, kind: input, shape index: {}]   ;;  %s3116_s6 = inlined_call_operand.vmem [shape: f32[1,128], index: 6, kind: input, shape index: {}]   ;;  %s3117_s7 = inlined_call_operand.hbm [shape: f32[8,128], index: 7, kind: output, shape index: {}]  }
   0x1   :  { %13 = vsyncpa [#allocation6], 0 }
   0x2   :  { %14 = vsyncpa [#allocation9], 0 }
   0x3   :  { %15 = vsyncpa [#allocation4], 0  ;;  %s2967_s24 = smov [#allocation5]   ;;  %s2849_s28 = scalar_lea.hbm %s3111_s1, 25088 }
   0x4   :  { %s31_s25 = sshll.u32 %s2967_s24, 4  ;;  %p2850_p0 = scmp.ne.s32.totalorder %s3111_s1, %s2849_s28  ;;  %s32_s25 = int_to_ptr.vmem [resolvable:$true] %s31_s25 }
   0x5   :  { %p2853_p1 = scmp.lt.u32.totalorder %s2849_s28, %s3111_s1 }
   0x7   :  { %p2855_p2 = pnand %p2853_p1, %p2850_p0 }
   0x9   :  { %2858 = shalt.err (!%p2855_p2)
}
   0xa   :  { %s2859_s10 = scalar_lea.vmem %s32_s25, 25088  ;;  %p2864_p4 = scmp.lt.s32.totalorder %s32_s25, %s32_s25 }
   0xb   :  { %p2860_p3 = scmp.ne.s32.totalorder %s32_s25, %s2859_s10  ;;  %p2865_p5 = scmp.lt.s32.totalorder %s2859_s10, %s2859_s10 }
   0xd   :  { %p2866_p6 = por %p2865_p5, %p2864_p4 }
   0xf   :  { %p2867_p7 = pnand %p2866_p6, %p2860_p3 }
  0x11   :  { %2870 = shalt.err (!%p2867_p7)
}
  0x12   :  { %s2968_s11 = smov 256   ;;  %s2969_s12 = smov 16  }
  0x13   :  { %37 = dma.hbm_to_vmem [thread:$0]  %s3111_s1, 25088, %s32_s25, [#allocation6], %s2968_s11, %s2968_s11, %s2969_s12  }
  0x14   :  { %s2970_s15 = smov [#allocation2]   ;;  %s2971_s17 = smov [#allocation7]  }
  0x15   :  { %s22_s16 = sshll.u32 %s2970_s15, 4  ;;  %s45_s18 = sshll.u32 %s2971_s17, 4  ;;  %s23_s16 = int_to_ptr.vmem [resolvable:$true] %s22_s16  ;;  %s46_s18 = int_to_ptr.vmem [resolvable:$true] %s45_s18 }
  0x16   :  { %s2871_s21 = scalar_lea.hbm %s3110_s0, 448 }
  0x17   :  { %p2872_p8 = scmp.ne.s32.totalorder %s3110_s0, %s2871_s21  ;;  %p2875_p9 = scmp.lt.u32.totalorder %s2871_s21, %s3110_s0 }
  0x19   :  { %p2877_p10 = pnand %p2875_p9, %p2872_p8 }
  0x1b   :  { %2880 = shalt.err (!%p2877_p10)
}
  0x1c   :  { %s2881_s1 = scalar_lea.vmem %s23_s16, 448  ;;  %p2886_p12 = scmp.lt.s32.totalorder %s23_s16, %s23_s16 }
  0x1d   :  { %p2882_p11 = scmp.ne.s32.totalorder %s23_s16, %s2881_s1  ;;  %p2887_p13 = scmp.lt.s32.totalorder %s2881_s1, %s2881_s1 }
  0x1f   :  { %p2888_p0 = por %p2887_p13, %p2886_p12 }
  0x21   :  { %p2889_p1 = pnand %p2888_p0, %p2882_p11 }
  0x23   :  { %2892 = shalt.err (!%p2889_p1)
}
  0x24   :  { %25 = dma.hbm_to_vmem [thread:$0]  %s3110_s0, 448, %s23_s16, [#allocation3]  }
  0x25   :  { %s2893_s30 = scalar_lea.hbm %s3113_s3, 4096 }
  0x26   :  { %p2894_p2 = scmp.ne.s32.totalorder %s3113_s3, %s2893_s30  ;;  %p2897_p3 = scmp.lt.u32.totalorder %s2893_s30, %s3113_s3 }
  0x28   :  { %p2899_p4 = pnand %p2897_p3, %p2894_p2 }
  0x2a   :  { %2902 = shalt.err (!%p2899_p4)
}
  0x2b   :  { %s2903_s12 = scalar_lea.vmem %s46_s18, 4096  ;;  %p2908_p6 = scmp.lt.s32.totalorder %s46_s18, %s46_s18 }
  0x2c   :  { %p2904_p5 = scmp.ne.s32.totalorder %s46_s18, %s2903_s12  ;;  %p2909_p7 = scmp.lt.s32.totalorder %s2903_s12, %s2903_s12 }
  0x2e   :  { %p2910_p8 = por %p2909_p7, %p2908_p6 }
  0x30   :  { %p2911_p9 = pnand %p2910_p8, %p2904_p5 }
  0x32   :  { %2914 = shalt.err (!%p2911_p9)
}
  0x33   :  { %s2972_s0 = smov 64   ;;  %s2973_s13 = smov 4  }
  0x34   :  { %51 = dma.hbm_to_vmem [thread:$0]  %s3113_s3, 4096, %s46_s18, [#allocation6], %s2972_s0, %s2972_s0, %s2973_s13  }
  0x35   :  { %s2974_s16 = smov [#allocation8]   ;;  %s2915_s21 = scalar_lea.hbm %s3115_s5, 1024 }
  0x36   :  { %s59_s17 = sshll.u32 %s2974_s16, 4  ;;  %p2916_p10 = scmp.ne.s32.totalorder %s3115_s5, %s2915_s21  ;;  %s60_s17 = int_to_ptr.vmem [resolvable:$true] %s59_s17 }
  0x37   :  { %p2919_p11 = scmp.lt.u32.totalorder %s2915_s21, %s3115_s5 }
  0x39   :  { %p2921_p12 = pnand %p2919_p11, %p2916_p10 }
  0x3b   :  { %2924 = shalt.err (!%p2921_p12)
}
  0x3c   :  { %s2925_s1 = scalar_lea.vmem %s60_s17, 1024  ;;  %p2930_p0 = scmp.lt.s32.totalorder %s60_s17, %s60_s17 }
  0x3d   :  { %p2926_p13 = scmp.ne.s32.totalorder %s60_s17, %s2925_s1  ;;  %p2931_p1 = scmp.lt.s32.totalorder %s2925_s1, %s2925_s1 }
  0x3f   :  { %p2932_p2 = por %p2931_p1, %p2930_p0 }
  0x41   :  { %p2933_p3 = pnand %p2932_p2, %p2926_p13 }
  0x43   :  { %2936 = shalt.err (!%p2933_p3)
}
  0x44   :  { %65 = dma.hbm_to_vmem [thread:$0]  %s3115_s5, 1024, %s60_s17, [#allocation9], %s2972_s0, %s2972_s0, %s2973_s13  }
  0x45   :  { %2959 = dma.done.wait [#allocation3], 448  }
  0x46   :  { %2960 = vsyncadd [#allocation3], 4294966848 }
  0x47   :  { %2961 = dma.done.wait [#allocation6], 29184  }
  0x48   :  { %2962 = vsyncadd [#allocation6], 4294938112 }
  0x49   :  { %2963 = dma.done.wait [#allocation9], 1024  }
  0x4a   :  { %2964 = vsyncadd [#allocation9], 4294966272  ;;  %v2975_v0 = vmov 0   ;;  %v2491_v1 = vld [vmem:[#allocation5 + $0x4] ss:$16 sps:$4 sm:$0xff]   ;;  %vm1307_vm0 = vcmask 130048  }
  0x4b   :  { %1466 = vmatprep.mubr.bf16.mxu1 %v2975_v0  ;;  %v2493_v2 = vld [vmem:[#allocation5 + $0x604] ss:$16 sps:$4 sm:$0xff]   ;;  %1311 = vmatprep.subr.bf16.mxu0 %v2491_v1  ;;  %v2495_v3 = vld [vmem:[#allocation5] ss:$16 sps:$4 sm:$0xff]   ;;  %v2499_v6 = vld [vmem:[#allocation2 + $0x18] ss:$0 sps:$4 sm:$0xff]  }
  0x4c   :  { %v2496_v4 = vld [vmem:[#allocation5 + $0x600] ss:$16 sps:$4 sm:$0xff]   ;;  %1434 = vmatprep.subr.bf16.mxu1 %v2493_v2  ;;  %v2497_v5 = vld [vmem:[#allocation5 + $0x24] ss:$16 sps:$4 sm:$0xff]   ;;  %1312 = vmatpush1.bf16.msra.mxu0 %v2495_v3  ;;  %v2500_v7 = vld [vmem:[#allocation5 + $0x8] ss:$16 sps:$4 sm:$0xff]  }
  0x4d   :  { %1435 = vmatpush1.bf16.msra.mxu1 %v2496_v4  ;;  %1313 = vmatprep.subr.bf16.mxu0 %v2497_v5  ;;  %v2502_v8 = vld [vmem:[#allocation5 + $0xc] ss:$16 sps:$4 sm:$0xff]   ;;  %v2503_v9 = vld [vmem:[#allocation5 + $0x20] ss:$16 sps:$4 sm:$0xff]   ;;  %v2504_v10 = vld [vmem:[#allocation5 + $0x44] ss:$16 sps:$4 sm:$0xff]  }
  0x4e   :  { %1475 = vmatprep.subr.bf16.mxu1 %v2502_v8  ;;  %v2506_v11 = vld [vmem:[#allocation5 + $0x28] ss:$16 sps:$4 sm:$0xff]   ;;  %v2508_v12 = vld [vmem:[#allocation5 + $0x2c] ss:$16 sps:$4 sm:$0xff]   ;;  %v2509_v13 = vld [vmem:[#allocation5 + $0x40] ss:$16 sps:$4 sm:$0xff]  }
  0x4f   :  { %v2510_v14 = vld [vmem:[#allocation5 + $0x64] ss:$16 sps:$4 sm:$0xff]   ;;  %v2514_v15 = vld [vmem:[#allocation5 + $0x4c] ss:$16 sps:$4 sm:$0xff]   ;;  %v2512_v16 = vld [vmem:[#allocation5 + $0x48] ss:$16 sps:$4 sm:$0xff]  }
  0x50   :  { %2335 = vmatmul.mubr.msk.bf16.vlgmr.msra.gmra.mrb[0].mxu1 %vm1307_vm0, %v2499_v6  ;;  %1314 = vmatpush1.bf16.msra.mxu0 %v2503_v9  ;;  %v2515_v17 = vld [vmem:[#allocation5 + $0x60] ss:$16 sps:$4 sm:$0xff]   ;;  %v2516_v18 = vld [vmem:[#allocation5 + $0x84] ss:$16 sps:$4 sm:$0xff]   ;;  %v2520_v19 = vld [vmem:[#allocation5 + $0x6c] ss:$16 sps:$4 sm:$0xff]  }
  0x51   :  { %1476 = vmatpush1.bf16.msra.mxu1 %v2500_v7  ;;  %1315 = vmatprep.subr.bf16.mxu0 %v2504_v10  ;;  %v2518_v20 = vld [vmem:[#allocation5 + $0x68] ss:$16 sps:$4 sm:$0xff]   ;;  %v2521_v21 = vld [vmem:[#allocation5 + $0x80] ss:$16 sps:$4 sm:$0xff]   ;;  %v2522_v22 = vld [vmem:[#allocation5 + $0xa4] ss:$16 sps:$4 sm:$0xff]  }
  0x52   :  { %1477 = vmatprep.subr.bf16.mxu1 %v2508_v12  ;;  %v2526_v23 = vld [vmem:[#allocation5 + $0x8c] ss:$16 sps:$4 sm:$0xff]   ;;  %v2524_v24 = vld [vmem:[#allocation5 + $0x88] ss:$16 sps:$4 sm:$0xff]   ;;  %v2527_v25 = vld [vmem:[#allocation5 + $0xa0] ss:$16 sps:$4 sm:$0xff]  }
  0x53   :  { %v2528_v26 = vld [vmem:[#allocation5 + $0xc4] ss:$16 sps:$4 sm:$0xff]   ;;  %v2532_v27 = vld [vmem:[#allocation5 + $0xac] ss:$16 sps:$4 sm:$0xff]   ;;  %v2530_v28 = vld [vmem:[#allocation5 + $0xa8] ss:$16 sps:$4 sm:$0xff]  }
  0x54   :  { %1316 = vmatpush1.bf16.msra.mxu0 %v2509_v13  ;;  %v2533_v29 = vld [vmem:[#allocation5 + $0xc0] ss:$16 sps:$4 sm:$0xff]   ;;  %v2534_v30 = vld [vmem:[#allocation5 + $0xe4] ss:$16 sps:$4 sm:$0xff]   ;;  %v2538_v31 = vld [vmem:[#allocation5 + $0xcc] ss:$16 sps:$4 sm:$0xff]  }
  0x55   :  { %1478 = vmatpush1.bf16.msra.mxu1 %v2506_v11  ;;  %1317 = vmatprep.subr.bf16.mxu0 %v2510_v14  ;;  %v2536_v32 = vld [vmem:[#allocation5 + $0xc8] ss:$16 sps:$4 sm:$0xff]   ;;  %v2539_v33 = vld [vmem:[#allocation5 + $0xe0] ss:$16 sps:$4 sm:$0xff]   ;;  %v2540_v34 = vld [vmem:[#allocation5 + $0x104] ss:$16 sps:$4 sm:$0xff]  }
  0x56   :  { %1479 = vmatprep.subr.bf16.mxu1 %v2514_v15  ;;  %v2544_v35 = vld [vmem:[#allocation5 + $0xec] ss:$16 sps:$4 sm:$0xff]   ;;  %v2542_v36 = vld [vmem:[#allocation5 + $0xe8] ss:$16 sps:$4 sm:$0xff]   ;;  %v2545_v37 = vld [vmem:[#allocation5 + $0x100] ss:$16 sps:$4 sm:$0xff]  }
  0x57   :  { %v2546_v38 = vld [vmem:[#allocation5 + $0x124] ss:$16 sps:$4 sm:$0xff]   ;;  %v2550_v39 = vld [vmem:[#allocation5 + $0x10c] ss:$16 sps:$4 sm:$0xff]   ;;  %v2548_v40 = vld [vmem:[#allocation5 + $0x108] ss:$16 sps:$4 sm:$0xff]  }
  0x58   :  { %1318 = vmatpush1.bf16.msra.mxu0 %v2515_v17  ;;  %v2551_v41 = vld [vmem:[#allocation5 + $0x120] ss:$16 sps:$4 sm:$0xff]   ;;  %v2552_v42 = vld [vmem:[#allocation5 + $0x144] ss:$16 sps:$4 sm:$0xff]   ;;  %v2556_v43 = vld [vmem:[#allocation5 + $0x12c] ss:$16 sps:$4 sm:$0xff]  }
  0x59   :  { %1480 = vmatpush1.bf16.msra.mxu1 %v2512_v16  ;;  %1319 = vmatprep.subr.bf16.mxu0 %v2516_v18  ;;  %v2554_v44 = vld [vmem:[#allocation5 + $0x128] ss:$16 sps:$4 sm:$0xff]   ;;  %v2557_v45 = vld [vmem:[#allocation5 + $0x140] ss:$16 sps:$4 sm:$0xff]   ;;  %v2558_v46 = vld [vmem:[#allocation5 + $0x164] ss:$16 sps:$4 sm:$0xff]  }
  0x5a   :  { %1481 = vmatprep.subr.bf16.mxu1 %v2520_v19  ;;  %v2562_v47 = vld [vmem:[#allocation5 + $0x14c] ss:$16 sps:$4 sm:$0xff]   ;;  %v2560_v48 = vld [vmem:[#allocation5 + $0x148] ss:$16 sps:$4 sm:$0xff]   ;;  %v2563_v50 = vld [vmem:[#allocation5 + $0x160] ss:$16 sps:$4 sm:$0xff]  }
  0x5b   :  { %v81_v49 = vld [vmem:[#allocation2] sm:$0xff]  ;;  %v2568_v53 = vld [vmem:[#allocation5 + $0x16c] ss:$16 sps:$4 sm:$0xff]   ;;  %v2569_v55 = vld [vmem:[#allocation5 + $0x180] ss:$16 sps:$4 sm:$0xff]   ;;  %vm2977_vm1 = vmmov 0  }
  0x5c   :  { %1320 = vmatpush1.bf16.msra.mxu0 %v2521_v21  ;;  %v2564_v51 = vld [vmem:[#allocation5 + $0x184] ss:$16 sps:$4 sm:$0xff]   ;;  %v2133_v52 = vcombine.high %v81_v49, %v81_v49  ;;  %v2566_v54 = vld [vmem:[#allocation5 + $0x168] ss:$16 sps:$4 sm:$0xff]   ;;  %v2574_v57 = vld [vmem:[#allocation5 + $0x18c] ss:$16 sps:$4 sm:$0xff]   ;;  %v2132_v7 = vcombine.low %v81_v49, %v81_v49 }
  0x5d   :  { %1482 = vmatpush1.bf16.msra.mxu1 %v2518_v20  ;;  %1321 = vmatprep.subr.bf16.mxu0 %v2522_v22  ;;  %v2570_v56 = vld [vmem:[#allocation5 + $0x1a4] ss:$16 sps:$4 sm:$0xff]   ;;  %v2572_v58 = vld [vmem:[#allocation5 + $0x188] ss:$16 sps:$4 sm:$0xff]   ;;  %v2575_v59 = vld [vmem:[#allocation5 + $0x1a0] ss:$16 sps:$4 sm:$0xff]  }
  0x5e   :  { %1483 = vmatprep.subr.bf16.mxu1 %v2526_v23  ;;  %1343 = vmatprep.mubr.bf16.mxu0 %v2133_v52  ;;  %v2576_v60 = vld [vmem:[#allocation5 + $0x1c4] ss:$16 sps:$4 sm:$0xff]   ;;  %v2580_v61 = vld [vmem:[#allocation5 + $0x1ac] ss:$16 sps:$4 sm:$0xff]   ;;  %v2578_v62 = vld [vmem:[#allocation5 + $0x1a8] ss:$16 sps:$4 sm:$0xff]  }
  0x5f   :  { %1507 = vmatprep.mubr.bf16.mxu1 %v2133_v52  ;;  %v2581_v63 = vld [vmem:[#allocation5 + $0x1c0] ss:$16 sps:$4 sm:$0xff]   ;;  %v2582_v1 = vld [vmem:[#allocation5 + $0x1e4] ss:$16 sps:$4 sm:$0xff]   ;;  %v2586_v2 = vld [vmem:[#allocation5 + $0x1cc] ss:$16 sps:$4 sm:$0xff]  }
  0x60   :  { %1322 = vmatpush1.bf16.msra.mxu0 %v2527_v25  ;;  %v2584_v3 = vld [vmem:[#allocation5 + $0x1c8] ss:$16 sps:$4 sm:$0xff]   ;;  %v2587_v4 = vld [vmem:[#allocation5 + $0x1e0] ss:$16 sps:$4 sm:$0xff]   ;;  %v2592_v5 = vld [vmem:[#allocation5 + $0x204] ss:$16 sps:$4 sm:$0xff]  }
  0x61   :  { %1484 = vmatpush1.bf16.msra.mxu1 %v2524_v24  ;;  %1323 = vmatprep.subr.bf16.mxu0 %v2528_v26  ;;  %v2595_v6 = vld [vmem:[#allocation5 + $0x1ec] ss:$16 sps:$4 sm:$0xff]   ;;  %v2590_v8 = vld [vmem:[#allocation5 + $0x200] ss:$16 sps:$4 sm:$0xff]   ;;  %v2593_v9 = vld [vmem:[#allocation5 + $0x1e8] ss:$16 sps:$4 sm:$0xff]  }
  0x62   :  { %1485 = vmatprep.subr.bf16.mxu1 %v2532_v27  ;;  %v2598_v10 = vld [vmem:[#allocation5 + $0x224] ss:$16 sps:$4 sm:$0xff]   ;;  %v2601_v11 = vld [vmem:[#allocation5 + $0x20c] ss:$16 sps:$4 sm:$0xff]   ;;  %v2596_v12 = vld [vmem:[#allocation5 + $0x220] ss:$16 sps:$4 sm:$0xff]  }
  0x63   :  { %v2599_v13 = vld [vmem:[#allocation5 + $0x208] ss:$16 sps:$4 sm:$0xff]   ;;  %v2604_v14 = vld [vmem:[#allocation5 + $0x244] ss:$16 sps:$4 sm:$0xff]   ;;  %v2607_v15 = vld [vmem:[#allocation5 + $0x22c] ss:$16 sps:$4 sm:$0xff]  }
  0x64   :  { %1324 = vmatpush1.bf16.msra.mxu0 %v2533_v29  ;;  %v2602_v16 = vld [vmem:[#allocation5 + $0x240] ss:$16 sps:$4 sm:$0xff]   ;;  %v2605_v17 = vld [vmem:[#allocation5 + $0x228] ss:$16 sps:$4 sm:$0xff]   ;;  %v2610_v18 = vld [vmem:[#allocation5 + $0x264] ss:$16 sps:$4 sm:$0xff]  }
  0x65   :  { %1486 = vmatpush1.bf16.msra.mxu1 %v2530_v28  ;;  %1325 = vmatprep.subr.bf16.mxu0 %v2534_v30  ;;  %v2613_v19 = vld [vmem:[#allocation5 + $0x24c] ss:$16 sps:$4 sm:$0xff]   ;;  %v2608_v20 = vld [vmem:[#allocation5 + $0x260] ss:$16 sps:$4 sm:$0xff]   ;;  %v2611_v21 = vld [vmem:[#allocation5 + $0x248] ss:$16 sps:$4 sm:$0xff]  }
  0x66   :  { %1487 = vmatprep.subr.bf16.mxu1 %v2538_v31  ;;  %v2616_v22 = vld [vmem:[#allocation5 + $0x284] ss:$16 sps:$4 sm:$0xff]   ;;  %v2619_v23 = vld [vmem:[#allocation5 + $0x26c] ss:$16 sps:$4 sm:$0xff]   ;;  %v2614_v24 = vld [vmem:[#allocation5 + $0x280] ss:$16 sps:$4 sm:$0xff]  }
  0x67   :  { %v2617_v25 = vld [vmem:[#allocation5 + $0x268] ss:$16 sps:$4 sm:$0xff]   ;;  %v2622_v26 = vld [vmem:[#allocation5 + $0x2a4] ss:$16 sps:$4 sm:$0xff]   ;;  %v2625_v27 = vld [vmem:[#allocation5 + $0x28c] ss:$16 sps:$4 sm:$0xff]  }
  0x68   :  { %1326 = vmatpush1.bf16.msra.mxu0 %v2539_v33  ;;  %v2620_v28 = vld [vmem:[#allocation5 + $0x2a0] ss:$16 sps:$4 sm:$0xff]   ;;  %v2623_v29 = vld [vmem:[#allocation5 + $0x288] ss:$16 sps:$4 sm:$0xff]   ;;  %v2628_v30 = vld [vmem:[#allocation5 + $0x2c4] ss:$16 sps:$4 sm:$0xff]  }
  0x69   :  { %1488 = vmatpush1.bf16.msra.mxu1 %v2536_v32  ;;  %1327 = vmatprep.subr.bf16.mxu0 %v2540_v34  ;;  %v2631_v31 = vld [vmem:[#allocation5 + $0x2ac] ss:$16 sps:$4 sm:$0xff]   ;;  %v2626_v33 = vld [vmem:[#allocation5 + $0x2c0] ss:$16 sps:$4 sm:$0xff]   ;;  %v2629_v34 = vld [vmem:[#allocation5 + $0x2a8] ss:$16 sps:$4 sm:$0xff]  }
  0x6a   :  { %1489 = vmatprep.subr.bf16.mxu1 %v2544_v35  ;;  %v3069_v32 = vld [vmem:[#allocation2 + $0x8] sm:$0xff]  ;;  %v2658_v52 = vld [vmem:[#allocation5 + $0x364] ss:$16 sps:$4 sm:$0xff]  }
  0x6b   :  { %v2135_v35 = vcombine.high %v3069_v32, %v3069_v32  ;;  %v2655_v49 = vld [vmem:[#allocation5 + $0x32c] ss:$16 sps:$4 sm:$0xff]  }
  0x6c   :  { %1328 = vmatpush1.bf16.msra.mxu0 %v2545_v37  ;;  %v2637_v37 = vld [vmem:[#allocation5 + $0x2cc] ss:$16 sps:$4 sm:$0xff]  }
  0x6d   :  { %1490 = vmatpush1.bf16.msra.mxu1 %v2542_v36  ;;  %1329 = vmatprep.subr.bf16.mxu0 %v2546_v38  ;;  %v2634_v36 = vld [vmem:[#allocation5 + $0x2e4] ss:$16 sps:$4 sm:$0xff]   ;;  %v2632_v38 = vld [vmem:[#allocation5 + $0x2e0] ss:$16 sps:$4 sm:$0xff]  }
  0x6e   :  { %1491 = vmatprep.subr.bf16.mxu1 %v2550_v39  ;;  %v2635_v39 = vld [vmem:[#allocation5 + $0x2c8] ss:$16 sps:$4 sm:$0xff]  }
  0x70   :  { %1330 = vmatpush1.bf16.msra.mxu0 %v2551_v41  ;;  %v2643_v41 = vld [vmem:[#allocation5 + $0x2ec] ss:$16 sps:$4 sm:$0xff]  }
  0x71   :  { %1492 = vmatpush1.bf16.msra.mxu1 %v2548_v40  ;;  %1331 = vmatprep.subr.bf16.mxu0 %v2552_v42  ;;  %v2640_v40 = vld [vmem:[#allocation5 + $0x304] ss:$16 sps:$4 sm:$0xff]   ;;  %v2638_v42 = vld [vmem:[#allocation5 + $0x300] ss:$16 sps:$4 sm:$0xff]  }
  0x72   :  { %1493 = vmatprep.subr.bf16.mxu1 %v2556_v43  ;;  %v2641_v43 = vld [vmem:[#allocation5 + $0x2e8] ss:$16 sps:$4 sm:$0xff]  }
  0x74   :  { %1332 = vmatpush1.bf16.msra.mxu0 %v2557_v45  ;;  %v2649_v45 = vld [vmem:[#allocation5 + $0x30c] ss:$16 sps:$4 sm:$0xff]  }
  0x75   :  { %1494 = vmatpush1.bf16.msra.mxu1 %v2554_v44  ;;  %1333 = vmatprep.subr.bf16.mxu0 %v2558_v46  ;;  %v2646_v44 = vld [vmem:[#allocation5 + $0x324] ss:$16 sps:$4 sm:$0xff]   ;;  %v2644_v46 = vld [vmem:[#allocation5 + $0x320] ss:$16 sps:$4 sm:$0xff]  }
  0x76   :  { %1495 = vmatprep.subr.bf16.mxu1 %v2562_v47  ;;  %v2647_v47 = vld [vmem:[#allocation5 + $0x308] ss:$16 sps:$4 sm:$0xff]  }
  0x78   :  { %1334 = vmatpush1.bf16.msra.mxu0 %v2563_v50  ;;  %v2650_v50 = vld [vmem:[#allocation5 + $0x340] ss:$16 sps:$4 sm:$0xff]  }
  0x79   :  { %1496 = vmatpush1.bf16.msra.mxu1 %v2560_v48  ;;  %1335 = vmatprep.subr.bf16.mxu0 %v2564_v51  ;;  %v2652_v48 = vld [vmem:[#allocation5 + $0x344] ss:$16 sps:$4 sm:$0xff]   ;;  %v2653_v51 = vld [vmem:[#allocation5 + $0x328] ss:$16 sps:$4 sm:$0xff]  }
  0x7a   :  { %1497 = vmatprep.subr.bf16.mxu1 %v2568_v53  ;;  %v2661_v53 = vld [vmem:[#allocation5 + $0x34c] ss:$16 sps:$4 sm:$0xff]  }
  0x7c   :  { %1336 = vmatpush1.bf16.msra.mxu0 %v2569_v55  ;;  %v2659_v55 = vld [vmem:[#allocation5 + $0x348] ss:$16 sps:$4 sm:$0xff]  }
  0x7d   :  { %1498 = vmatpush1.bf16.msra.mxu1 %v2566_v54  ;;  %1337 = vmatprep.subr.bf16.mxu0 %v2570_v56  ;;  %v2656_v54 = vld [vmem:[#allocation5 + $0x360] ss:$16 sps:$4 sm:$0xff]   ;;  %v2664_v56 = vld [vmem:[#allocation5 + $0x384] ss:$16 sps:$4 sm:$0xff]  }
  0x7e   :  { %1499 = vmatprep.subr.bf16.mxu1 %v2574_v57  ;;  %v2667_v57 = vld [vmem:[#allocation5 + $0x36c] ss:$16 sps:$4 sm:$0xff]  }
  0x80   :  { %1338 = vmatpush1.bf16.msra.mxu0 %v2575_v59  ;;  %v2665_v59 = vld [vmem:[#allocation5 + $0x368] ss:$16 sps:$4 sm:$0xff]  }
  0x81   :  { %1500 = vmatpush1.bf16.msra.mxu1 %v2572_v58  ;;  %1339 = vmatprep.subr.bf16.mxu0 %v2576_v60  ;;  %v2662_v58 = vld [vmem:[#allocation5 + $0x380] ss:$16 sps:$4 sm:$0xff]   ;;  %v2670_v60 = vld [vmem:[#allocation5 + $0x3a4] ss:$16 sps:$4 sm:$0xff]  }
  0x82   :  { %1501 = vmatprep.subr.bf16.mxu1 %v2580_v61  ;;  %v2673_v61 = vld [vmem:[#allocation5 + $0x38c] ss:$16 sps:$4 sm:$0xff]  }
  0x84   :  { %1340 = vmatpush1.bf16.msra.mxu0 %v2581_v63  ;;  %v2671_v63 = vld [vmem:[#allocation5 + $0x388] ss:$16 sps:$4 sm:$0xff]  }
  0x85   :  { %1502 = vmatpush1.bf16.msra.mxu1 %v2578_v62  ;;  %1341 = vmatprep.subr.bf16.mxu0 %v2582_v1  ;;  %v2668_v62 = vld [vmem:[#allocation5 + $0x3a0] ss:$16 sps:$4 sm:$0xff]   ;;  %v2676_v1 = vld [vmem:[#allocation5 + $0x3c4] ss:$16 sps:$4 sm:$0xff]  }
  0x86   :  { %1503 = vmatprep.subr.bf16.mxu1 %v2586_v2  ;;  %v2679_v2 = vld [vmem:[#allocation5 + $0x3ac] ss:$16 sps:$4 sm:$0xff]  }
  0x88   :  { %1342 = vmatpush1.bf16.msra.mxu0 %v2587_v4  ;;  %v2677_v4 = vld [vmem:[#allocation5 + $0x3a8] ss:$16 sps:$4 sm:$0xff]  }
  0x89   :  { %1504 = vmatpush1.bf16.msra.mxu1 %v2584_v3  ;;  %1352 = vmatprep.subr.bf16.mxu0 %v2592_v5  ;;  %v2674_v3 = vld [vmem:[#allocation5 + $0x3c0] ss:$16 sps:$4 sm:$0xff]   ;;  %v2682_v5 = vld [vmem:[#allocation5 + $0x3e4] ss:$16 sps:$4 sm:$0xff]  }
  0x8a   :  { %1505 = vmatprep.subr.bf16.mxu1 %v2595_v6  ;;  %v2685_v6 = vld [vmem:[#allocation5 + $0x3cc] ss:$16 sps:$4 sm:$0xff]  }
  0x8b   :  { %1344 = vmatmul.mubr.bf16.vlgmr.msra.gmra.mrb[0].mxu0 %v2132_v7 }
  0x8c   :  { %1353 = vmatpush1.bf16.msra.mxu0 %v2590_v8  ;;  %1384 = vmatprep.mubr.bf16.mxu0 %v2135_v35  ;;  %v2683_v8 = vld [vmem:[#allocation5 + $0x3c8] ss:$16 sps:$4 sm:$0xff]  }
  0x8d   :  { %1506 = vmatpush1.bf16.msra.mxu1 %v2593_v9  ;;  %1354 = vmatprep.subr.bf16.mxu0 %v2598_v10  ;;  %v2690_v9 = vld [vmem:[#allocation5 + $0x404] ss:$16 sps:$4 sm:$0xff]   ;;  %v2693_v10 = vld [vmem:[#allocation5 + $0x3ec] ss:$16 sps:$4 sm:$0xff]  }
  0x8e   :  { %1516 = vmatprep.subr.bf16.mxu1 %v2601_v11  ;;  %v2134_v11 = vcombine.low %v3069_v32, %v3069_v32  ;;  %v2720_v32 = vld [vmem:[#allocation5 + $0x4a4] ss:$16 sps:$4 sm:$0xff]  }
  0x90   :  { %1508 = vmatmul.mubr.bf16.vlgmr.msra.gmra.mrb[4].mxu1 %v2132_v7  ;;  %1355 = vmatpush1.bf16.msra.mxu0 %v2596_v12  ;;  %v2680_v7 = vld [vmem:[#allocation5 + $0x3e0] ss:$16 sps:$4 sm:$0xff]  }
  0x91   :  { %1517 = vmatpush1.bf16.msra.mxu1 %v2599_v13  ;;  %1356 = vmatprep.subr.bf16.mxu0 %v2604_v14  ;;  %v2688_v12 = vld [vmem:[#allocation5 + $0x400] ss:$16 sps:$4 sm:$0xff]   ;;  %v2691_v13 = vld [vmem:[#allocation5 + $0x3e8] ss:$16 sps:$4 sm:$0xff]   ;;  %v2696_v14 = vld [vmem:[#allocation5 + $0x424] ss:$16 sps:$4 sm:$0xff]  }
  0x92   :  { %1518 = vmatprep.subr.bf16.mxu1 %v2607_v15  ;;  %1548 = vmatprep.mubr.bf16.mxu1 %v2135_v35  ;;  %v2699_v15 = vld [vmem:[#allocation5 + $0x40c] ss:$16 sps:$4 sm:$0xff]   ;;  %v2721_v35 = vld [vmem:[#allocation5 + $0x488] ss:$16 sps:$4 sm:$0xff]  }
  0x94   :  { %1357 = vmatpush1.bf16.msra.mxu0 %v2602_v16  ;;  %v3075_v16 = vld [vmem:[#allocation2 + $0x10] sm:$0xff] }
  0x95   :  { %1519 = vmatpush1.bf16.msra.mxu1 %v2605_v17  ;;  %1358 = vmatprep.subr.bf16.mxu0 %v2610_v18  ;;  %v2694_v17 = vld [vmem:[#allocation5 + $0x420] ss:$16 sps:$4 sm:$0xff]   ;;  %v2137_v18 = vcombine.high %v3075_v16, %v3075_v16 }
  0x96   :  { %1520 = vmatprep.subr.bf16.mxu1 %v2613_v19  ;;  %v2697_v19 = vld [vmem:[#allocation5 + $0x408] ss:$16 sps:$4 sm:$0xff]  }
  0x98   :  { %1359 = vmatpush1.bf16.msra.mxu0 %v2608_v20  ;;  %v2702_v20 = vld [vmem:[#allocation5 + $0x444] ss:$16 sps:$4 sm:$0xff]  }
  0x99   :  { %1521 = vmatpush1.bf16.msra.mxu1 %v2611_v21  ;;  %1360 = vmatprep.subr.bf16.mxu0 %v2616_v22  ;;  %v2705_v21 = vld [vmem:[#allocation5 + $0x42c] ss:$16 sps:$4 sm:$0xff]   ;;  %v2700_v22 = vld [vmem:[#allocation5 + $0x440] ss:$16 sps:$4 sm:$0xff]  }
  0x9a   :  { %1522 = vmatprep.subr.bf16.mxu1 %v2619_v23  ;;  %v2703_v23 = vld [vmem:[#allocation5 + $0x428] ss:$16 sps:$4 sm:$0xff]  }
  0x9c   :  { %1361 = vmatpush1.bf16.msra.mxu0 %v2614_v24  ;;  %v2708_v24 = vld [vmem:[#allocation5 + $0x464] ss:$16 sps:$4 sm:$0xff]  }
  0x9d   :  { %1523 = vmatpush1.bf16.msra.mxu1 %v2617_v25  ;;  %1362 = vmatprep.subr.bf16.mxu0 %v2622_v26  ;;  %v2711_v25 = vld [vmem:[#allocation5 + $0x44c] ss:$16 sps:$4 sm:$0xff]   ;;  %v2706_v26 = vld [vmem:[#allocation5 + $0x460] ss:$16 sps:$4 sm:$0xff]  }
  0x9e   :  { %1524 = vmatprep.subr.bf16.mxu1 %v2625_v27  ;;  %v2709_v27 = vld [vmem:[#allocation5 + $0x448] ss:$16 sps:$4 sm:$0xff]  }
  0xa0   :  { %1363 = vmatpush1.bf16.msra.mxu0 %v2620_v28  ;;  %v2714_v28 = vld [vmem:[#allocation5 + $0x484] ss:$16 sps:$4 sm:$0xff]  }
  0xa1   :  { %1525 = vmatpush1.bf16.msra.mxu1 %v2623_v29  ;;  %1364 = vmatprep.subr.bf16.mxu0 %v2628_v30  ;;  %v2717_v29 = vld [vmem:[#allocation5 + $0x46c] ss:$16 sps:$4 sm:$0xff]   ;;  %v2712_v30 = vld [vmem:[#allocation5 + $0x480] ss:$16 sps:$4 sm:$0xff]  }
  0xa2   :  { %1526 = vmatprep.subr.bf16.mxu1 %v2631_v31  ;;  %v2715_v31 = vld [vmem:[#allocation5 + $0x468] ss:$16 sps:$4 sm:$0xff]  }
  0xa4   :  { %1365 = vmatpush1.bf16.msra.mxu0 %v2626_v33  ;;  %v2723_v33 = vld [vmem:[#allocation5 + $0x48c] ss:$16 sps:$4 sm:$0xff]  }
  0xa5   :  { %1527 = vmatpush1.bf16.msra.mxu1 %v2629_v34  ;;  %1366 = vmatprep.subr.bf16.mxu0 %v2634_v36  ;;  %v2718_v34 = vld [vmem:[#allocation5 + $0x4a0] ss:$16 sps:$4 sm:$0xff]   ;;  %v2726_v36 = vld [vmem:[#allocation5 + $0x4c4] ss:$16 sps:$4 sm:$0xff]  }
  0xa6   :  { %1528 = vmatprep.subr.bf16.mxu1 %v2637_v37  ;;  %v2729_v37 = vld [vmem:[#allocation5 + $0x4ac] ss:$16 sps:$4 sm:$0xff]  }
  0xa8   :  { %1367 = vmatpush1.bf16.msra.mxu0 %v2632_v38  ;;  %v2724_v38 = vld [vmem:[#allocation5 + $0x4c0] ss:$16 sps:$4 sm:$0xff]  }
  0xa9   :  { %1529 = vmatpush1.bf16.msra.mxu1 %v2635_v39  ;;  %1368 = vmatprep.subr.bf16.mxu0 %v2640_v40  ;;  %v2727_v39 = vld [vmem:[#allocation5 + $0x4a8] ss:$16 sps:$4 sm:$0xff]   ;;  %v2732_v40 = vld [vmem:[#allocation5 + $0x4e4] ss:$16 sps:$4 sm:$0xff]  }
  0xaa   :  { %1530 = vmatprep.subr.bf16.mxu1 %v2643_v41  ;;  %v2735_v41 = vld [vmem:[#allocation5 + $0x4cc] ss:$16 sps:$4 sm:$0xff]  }
  0xac   :  { %1369 = vmatpush1.bf16.msra.mxu0 %v2638_v42  ;;  %v2730_v42 = vld [vmem:[#allocation5 + $0x4e0] ss:$16 sps:$4 sm:$0xff]  }
  0xad   :  { %1531 = vmatpush1.bf16.msra.mxu1 %v2641_v43  ;;  %1370 = vmatprep.subr.bf16.mxu0 %v2646_v44  ;;  %v2733_v43 = vld [vmem:[#allocation5 + $0x4c8] ss:$16 sps:$4 sm:$0xff]   ;;  %v2738_v44 = vld [vmem:[#allocation5 + $0x504] ss:$16 sps:$4 sm:$0xff]  }
  0xae   :  { %1532 = vmatprep.subr.bf16.mxu1 %v2649_v45  ;;  %v2741_v45 = vld [vmem:[#allocation5 + $0x4ec] ss:$16 sps:$4 sm:$0xff]  }
  0xb0   :  { %1371 = vmatpush1.bf16.msra.mxu0 %v2644_v46  ;;  %v2736_v46 = vld [vmem:[#allocation5 + $0x500] ss:$16 sps:$4 sm:$0xff]  }
  0xb1   :  { %1533 = vmatpush1.bf16.msra.mxu1 %v2647_v47  ;;  %1372 = vmatprep.subr.bf16.mxu0 %v2652_v48  ;;  %v2739_v47 = vld [vmem:[#allocation5 + $0x4e8] ss:$16 sps:$4 sm:$0xff]   ;;  %v2744_v48 = vld [vmem:[#allocation5 + $0x524] ss:$16 sps:$4 sm:$0xff]  }
  0xb2   :  { %1534 = vmatprep.subr.bf16.mxu1 %v2655_v49  ;;  %v2747_v49 = vld [vmem:[#allocation5 + $0x50c] ss:$16 sps:$4 sm:$0xff]  }
  0xb4   :  { %1373 = vmatpush1.bf16.msra.mxu0 %v2650_v50  ;;  %v2742_v50 = vld [vmem:[#allocation5 + $0x520] ss:$16 sps:$4 sm:$0xff]  }
  0xb5   :  { %1535 = vmatpush1.bf16.msra.mxu1 %v2653_v51  ;;  %1374 = vmatprep.subr.bf16.mxu0 %v2658_v52  ;;  %v2745_v51 = vld [vmem:[#allocation5 + $0x508] ss:$16 sps:$4 sm:$0xff]   ;;  %v2750_v52 = vld [vmem:[#allocation5 + $0x544] ss:$16 sps:$4 sm:$0xff]  }
  0xb6   :  { %1536 = vmatprep.subr.bf16.mxu1 %v2661_v53  ;;  %v2753_v53 = vld [vmem:[#allocation5 + $0x52c] ss:$16 sps:$4 sm:$0xff]  }
  0xb8   :  { %1375 = vmatpush1.bf16.msra.mxu0 %v2656_v54  ;;  %v2748_v54 = vld [vmem:[#allocation5 + $0x540] ss:$16 sps:$4 sm:$0xff]  }
  0xb9   :  { %1537 = vmatpush1.bf16.msra.mxu1 %v2659_v55  ;;  %1376 = vmatprep.subr.bf16.mxu0 %v2664_v56  ;;  %v2751_v55 = vld [vmem:[#allocation5 + $0x528] ss:$16 sps:$4 sm:$0xff]   ;;  %v2756_v56 = vld [vmem:[#allocation5 + $0x564] ss:$16 sps:$4 sm:$0xff]  }
  0xba   :  { %1538 = vmatprep.subr.bf16.mxu1 %v2667_v57  ;;  %v2759_v57 = vld [vmem:[#allocation5 + $0x54c] ss:$16 sps:$4 sm:$0xff]  }
  0xbc   :  { %1377 = vmatpush1.bf16.msra.mxu0 %v2662_v58  ;;  %v2754_v58 = vld [vmem:[#allocation5 + $0x560] ss:$16 sps:$4 sm:$0xff]  }
  0xbd   :  { %1539 = vmatpush1.bf16.msra.mxu1 %v2665_v59  ;;  %1378 = vmatprep.subr.bf16.mxu0 %v2670_v60  ;;  %v2757_v59 = vld [vmem:[#allocation5 + $0x548] ss:$16 sps:$4 sm:$0xff]   ;;  %v2762_v60 = vld [vmem:[#allocation5 + $0x584] ss:$16 sps:$4 sm:$0xff]  }
  0xbe   :  { %1540 = vmatprep.subr.bf16.mxu1 %v2673_v61  ;;  %v2765_v61 = vld [vmem:[#allocation5 + $0x56c] ss:$16 sps:$4 sm:$0xff]  }
  0xc0   :  { %1379 = vmatpush1.bf16.msra.mxu0 %v2668_v62  ;;  %v2760_v62 = vld [vmem:[#allocation5 + $0x580] ss:$16 sps:$4 sm:$0xff]  }
  0xc1   :  { %1541 = vmatpush1.bf16.msra.mxu1 %v2671_v63  ;;  %1380 = vmatprep.subr.bf16.mxu0 %v2676_v1  ;;  %v2763_v63 = vld [vmem:[#allocation5 + $0x568] ss:$16 sps:$4 sm:$0xff]   ;;  %v2768_v1 = vld [vmem:[#allocation5 + $0x5a4] ss:$16 sps:$4 sm:$0xff]  }
  0xc2   :  { %1542 = vmatprep.subr.bf16.mxu1 %v2679_v2  ;;  %v2771_v2 = vld [vmem:[#allocation5 + $0x58c] ss:$16 sps:$4 sm:$0xff]  }
  0xc4   :  { %1381 = vmatpush1.bf16.msra.mxu0 %v2674_v3  ;;  %v2766_v3 = vld [vmem:[#allocation5 + $0x5a0] ss:$16 sps:$4 sm:$0xff]  }
  0xc5   :  { %1543 = vmatpush1.bf16.msra.mxu1 %v2677_v4  ;;  %1382 = vmatprep.subr.bf16.mxu0 %v2682_v5  ;;  %v2769_v4 = vld [vmem:[#allocation5 + $0x588] ss:$16 sps:$4 sm:$0xff]   ;;  %v2774_v5 = vld [vmem:[#allocation5 + $0x5c4] ss:$16 sps:$4 sm:$0xff]  }
  0xc6   :  { %1544 = vmatprep.subr.bf16.mxu1 %v2685_v6  ;;  %v2777_v6 = vld [vmem:[#allocation5 + $0x5ac] ss:$16 sps:$4 sm:$0xff]  }
  0xc8   :  { %1383 = vmatpush1.bf16.msra.mxu0 %v2680_v7  ;;  %v2772_v7 = vld [vmem:[#allocation5 + $0x5c0] ss:$16 sps:$4 sm:$0xff]  }
  0xc9   :  { %1545 = vmatpush1.bf16.msra.mxu1 %v2683_v8  ;;  %1393 = vmatprep.subr.bf16.mxu0 %v2690_v9  ;;  %v2775_v8 = vld [vmem:[#allocation5 + $0x5a8] ss:$16 sps:$4 sm:$0xff]   ;;  %v2780_v9 = vld [vmem:[#allocation5 + $0x5e4] ss:$16 sps:$4 sm:$0xff]  }
  0xca   :  { %1546 = vmatprep.subr.bf16.mxu1 %v2693_v10  ;;  %v2783_v10 = vld [vmem:[#allocation5 + $0x5cc] ss:$16 sps:$4 sm:$0xff]  }
  0xcb   :  { %1385 = vmatmul.mubr.bf16.vlgmr.msra.gmra.mrb[0].mxu0 %v2134_v11 }
  0xcc   :  { %1394 = vmatpush1.bf16.msra.mxu0 %v2688_v12  ;;  %1425 = vmatprep.mubr.bf16.mxu0 %v2137_v18  ;;  %v2781_v12 = vld [vmem:[#allocation5 + $0x5c8] ss:$16 sps:$4 sm:$0xff]  }
  0xcd   :  { %1547 = vmatpush1.bf16.msra.mxu1 %v2691_v13  ;;  %1395 = vmatprep.subr.bf16.mxu0 %v2696_v14  ;;  %v2788_v13 = vld [vmem:[#allocation5 + $0x5ec] ss:$16 sps:$4 sm:$0xff]   ;;  %v2792_v14 = vld [vmem:[#allocation7 + $0x40] sm:$0xff]  }
  0xce   :  { %1557 = vmatprep.subr.bf16.mxu1 %v2699_v15  ;;  %v2136_v15 = vcombine.low %v3075_v16, %v3075_v16  ;;  %v2797_v16 = vld [vmem:[#allocation7 + $0x10] sm:$0xff]  }
  0xd0   :  { %1549 = vmatmul.mubr.bf16.vlgmr.msra.gmra.mrb[4].mxu1 %v2134_v11  ;;  %1396 = vmatpush1.bf16.msra.mxu0 %v2694_v17  ;;  %v2778_v11 = vld [vmem:[#allocation5 + $0x5e0] ss:$16 sps:$4 sm:$0xff]   ;;  %v2786_v17 = vld [vmem:[#allocation5 + $0x5e8] ss:$16 sps:$4 sm:$0xff]  }
  0xd1   :  { %1558 = vmatpush1.bf16.msra.mxu1 %v2697_v19  ;;  %1397 = vmatprep.subr.bf16.mxu0 %v2702_v20  ;;  %v2791_v19 = vld [vmem:[#allocation5 + $0x60c] ss:$16 sps:$4 sm:$0xff]  }
  0xd2   :  { %1559 = vmatprep.subr.bf16.mxu1 %v2705_v21  ;;  %1589 = vmatprep.mubr.bf16.mxu1 %v2137_v18  ;;  %v2793_v18 = vld [vmem:[#allocation7] sm:$0xff]   ;;  %v2794_v20 = vld [vmem:[#allocation7 + $0x48] sm:$0xff]  }
  0xd3   :  { %v2789_v21 = vld [vmem:[#allocation5 + $0x608] ss:$16 sps:$4 sm:$0xff]  }
  0xd4   :  { %1398 = vmatpush1.bf16.msra.mxu0 %v2700_v22  ;;  %v2795_v22 = vld [vmem:[#allocation7 + $0x8] sm:$0xff]  }
  0xd5   :  { %1560 = vmatpush1.bf16.msra.mxu1 %v2703_v23  ;;  %1399 = vmatprep.subr.bf16.mxu0 %v2708_v24  ;;  %v2796_v23 = vld [vmem:[#allocation7 + $0x50] sm:$0xff]   ;;  %v2848_v24 = vld [vmem:[#allocation2 + $0x18] ss:$0 sps:$4 sm:$0xff]  }
  0xd6   :  { %1561 = vmatprep.subr.bf16.mxu1 %v2711_v25 }
  0xd8   :  { %1400 = vmatpush1.bf16.msra.mxu0 %v2706_v26 }
  0xd9   :  { %1562 = vmatpush1.bf16.msra.mxu1 %v2709_v27  ;;  %1401 = vmatprep.subr.bf16.mxu0 %v2714_v28 }
  0xda   :  { %1563 = vmatprep.subr.bf16.mxu1 %v2717_v29  ;;  %v2798_v29 = vld [vmem:[#allocation7 + $0x58] sm:$0xff]  }
  0xdc   :  { %1402 = vmatpush1.bf16.msra.mxu0 %v2712_v30  ;;  %v2799_v30 = vld [vmem:[#allocation7 + $0x18] sm:$0xff]  }
  0xdd   :  { %1564 = vmatpush1.bf16.msra.mxu1 %v2715_v31  ;;  %1403 = vmatprep.subr.bf16.mxu0 %v2720_v32  ;;  %v2800_v31 = vld [vmem:[#allocation7 + $0xc0] sm:$0xff]  }
  0xde   :  { %1565 = vmatprep.subr.bf16.mxu1 %v2723_v33  ;;  %v2801_v32 = vld [vmem:[#allocation7 + $0x80] sm:$0xff]  }
  0xdf   :  { %v2803_v33 = vld [vmem:[#allocation7 + $0x20] sm:$0xff]  }
  0xe0   :  { %1404 = vmatpush1.bf16.msra.mxu0 %v2718_v34  ;;  %v2804_v34 = vld [vmem:[#allocation7 + $0xc8] sm:$0xff]  }
  0xe1   :  { %1566 = vmatpush1.bf16.msra.mxu1 %v2721_v35  ;;  %1405 = vmatprep.subr.bf16.mxu0 %v2726_v36  ;;  %v2805_v35 = vld [vmem:[#allocation7 + $0x88] sm:$0xff]  }
  0xe2   :  { %1567 = vmatprep.subr.bf16.mxu1 %v2729_v37  ;;  %v2806_v36 = vld [vmem:[#allocation7 + $0x68] sm:$0xff]  }
  0xe3   :  { %v2807_v37 = vld [vmem:[#allocation7 + $0x28] sm:$0xff]  }
  0xe4   :  { %1406 = vmatpush1.bf16.msra.mxu0 %v2724_v38  ;;  %v2808_v38 = vld [vmem:[#allocation7 + $0xd0] sm:$0xff]  }
  0xe5   :  { %1568 = vmatpush1.bf16.msra.mxu1 %v2727_v39  ;;  %1407 = vmatprep.subr.bf16.mxu0 %v2732_v40  ;;  %v2809_v39 = vld [vmem:[#allocation7 + $0x90] sm:$0xff]  }
  0xe6   :  { %1569 = vmatprep.subr.bf16.mxu1 %v2735_v41  ;;  %v2810_v40 = vld [vmem:[#allocation7 + $0x70] sm:$0xff]  }
  0xe7   :  { %v2811_v41 = vld [vmem:[#allocation7 + $0x30] sm:$0xff]  }
  0xe8   :  { %1408 = vmatpush1.bf16.msra.mxu0 %v2730_v42  ;;  %v2812_v42 = vld [vmem:[#allocation7 + $0xd8] sm:$0xff]  }
  0xe9   :  { %1570 = vmatpush1.bf16.msra.mxu1 %v2733_v43  ;;  %1409 = vmatprep.subr.bf16.mxu0 %v2738_v44  ;;  %v2813_v43 = vld [vmem:[#allocation7 + $0x98] sm:$0xff]  }
  0xea   :  { %1571 = vmatprep.subr.bf16.mxu1 %v2741_v45  ;;  %v2814_v44 = vld [vmem:[#allocation7 + $0x78] sm:$0xff]  }
  0xeb   :  { %v2815_v45 = vld [vmem:[#allocation7 + $0x38] sm:$0xff]  }
  0xec   :  { %1410 = vmatpush1.bf16.msra.mxu0 %v2736_v46  ;;  %v2816_v46 = vld [vmem:[#allocation7 + $0xe0] sm:$0xff]  }
  0xed   :  { %1572 = vmatpush1.bf16.msra.mxu1 %v2739_v47  ;;  %1411 = vmatprep.subr.bf16.mxu0 %v2744_v48  ;;  %v2817_v47 = vld [vmem:[#allocation7 + $0xa0] sm:$0xff]   ;;  %v2818_v48 = vld [vmem:[#allocation7 + $0xe8] sm:$0xff]  }
  0xee   :  { %1573 = vmatprep.subr.bf16.mxu1 %v2747_v49  ;;  %v2819_v49 = vld [vmem:[#allocation7 + $0xa8] sm:$0xff]  }
  0xf0   :  { %1412 = vmatpush1.bf16.msra.mxu0 %v2742_v50  ;;  %v2820_v50 = vld [vmem:[#allocation7 + $0xf0] sm:$0xff]  }
  0xf1   :  { %1574 = vmatpush1.bf16.msra.mxu1 %v2745_v51  ;;  %1413 = vmatprep.subr.bf16.mxu0 %v2750_v52  ;;  %v2821_v51 = vld [vmem:[#allocation7 + $0xb0] sm:$0xff]   ;;  %v2822_v52 = vld [vmem:[#allocation7 + $0xf8] sm:$0xff]  }
  0xf2   :  { %1575 = vmatprep.subr.bf16.mxu1 %v2753_v53  ;;  %v2823_v53 = vld [vmem:[#allocation7 + $0xb8] sm:$0xff]  }
  0xf4   :  { %1414 = vmatpush1.bf16.msra.mxu0 %v2748_v54  ;;  %v283_v54 = vlaneseq }
  0xf5   :  { %1576 = vmatpush1.bf16.msra.mxu1 %v2751_v55  ;;  %1415 = vmatprep.subr.bf16.mxu0 %v2756_v56 }
  0xf6   :  { %1577 = vmatprep.subr.bf16.mxu1 %v2759_v57  ;;  %v284_v55 = vshrl.u32 %v283_v54, 7  ;;  %v281_v57 = vld [vmem:[%s3112_s2] sm:$0xf] }
  0xf8   :  { %1416 = vmatpush1.bf16.msra.mxu0 %v2754_v58  ;;  %v285_v56 = vsub.s32 0, %v284_v55  ;;  %v289_v58 = vsub.s32 1, %v284_v55 }
  0xf9   :  { %1578 = vmatpush1.bf16.msra.mxu1 %v2757_v59  ;;  %1417 = vmatprep.subr.bf16.mxu0 %v2762_v60 }
  0xfa   :  { %1579 = vmatprep.subr.bf16.mxu1 %v2765_v61  ;;  %v286_v59 = vrot.slane %v281_v57, %v285_v56  ;;  %v290_v60 = vrot.slane %v281_v57, %v289_v58 }
  0xfc   :  { %1418 = vmatpush1.bf16.msra.mxu0 %v2760_v62 }
  0xfd   :  { %1580 = vmatpush1.bf16.msra.mxu1 %v2763_v63  ;;  %1419 = vmatprep.subr.bf16.mxu0 %v2768_v1 }
  0xfe   :  { %1581 = vmatprep.subr.bf16.mxu1 %v2771_v2 }
 0x100   :  { %1420 = vmatpush1.bf16.msra.mxu0 %v2766_v3 }
 0x101   :  { %1582 = vmatpush1.bf16.msra.mxu1 %v2769_v4  ;;  %1421 = vmatprep.subr.bf16.mxu0 %v2774_v5 }
 0x102   :  { %1583 = vmatprep.subr.bf16.mxu1 %v2777_v6  ;;  %v293_v6 = vsub.s32 2, %v284_v55 }
 0x104   :  { %1422 = vmatpush1.bf16.msra.mxu0 %v2772_v7  ;;  %v297_v7 = vsub.s32 3, %v284_v55 }
 0x105   :  { %1584 = vmatpush1.bf16.msra.mxu1 %v2775_v8  ;;  %1423 = vmatprep.subr.bf16.mxu0 %v2780_v9  ;;  %v294_v8 = vrot.slane %v281_v57, %v293_v6 }
 0x106   :  { %1585 = vmatprep.subr.bf16.mxu1 %v2783_v10  ;;  %v298_v9 = vrot.slane %v281_v57, %v297_v7 }
 0x108   :  { %1424 = vmatpush1.bf16.msra.mxu0 %v2778_v11 }
 0x109   :  { %1586 = vmatpush1.bf16.msra.mxu1 %v2781_v12  ;;  %2380 = vmatprep.subr.bf16.mxu0 %v2792_v14 }
 0x10a   :  { %1587 = vmatprep.subr.bf16.mxu1 %v2788_v13 }
 0x10b   :  { %1426 = vmatmul.mubr.bf16.vlgmr.msra.gmra.mrb[0].mxu0 %v2136_v15 }
 0x10c   :  { %2381 = vmatpush3.bf16.msra.mxu0 %v2793_v18 }
 0x10d   :  { %1588 = vmatpush1.bf16.msra.mxu1 %v2786_v17  ;;  %2382 = vmatprep.subr.bf16.mxu0 %v2794_v20 }
 0x10e   :  { %1598 = vmatprep.subr.bf16.mxu1 %v2791_v19 }
 0x110   :  { %1590 = vmatmul.mubr.bf16.vlgmr.msra.gmra.mrb[4].mxu1 %v2136_v15  ;;  %2383 = vmatpush3.bf16.msra.mxu0 %v2795_v22 }
 0x111   :  { %1599 = vmatpush1.bf16.msra.mxu1 %v2789_v21  ;;  %1630 = vmatprep.mubr.bf16.mxu1 %v2975_v0  ;;  %v2802_v0 = vld [vmem:[#allocation7 + $0x60] sm:$0xff]  }
 0x112   :  { %2384 = vmatprep.subr.bf16.mxu0 %v2796_v23  ;;  %2402 = vmatprep.subr.bf16.mxu1 %v2800_v31  ;;  %v2830_v31 = vld [vmem:[#allocation8 + $0x30] sm:$0xff]  }
 0x114   :  { %2385 = vmatpush3.bf16.msra.mxu0 %v2797_v16 }
 0x115   :  { %2386 = vmatprep.subr.bf16.mxu0 %v2798_v29  ;;  %v2828_v29 = vld [vmem:[#allocation8 + $0x20] sm:$0xff]  }
 0x118   :  { %2387 = vmatpush3.bf16.msra.mxu0 %v2799_v30  ;;  %v2829_v30 = vld [vmem:[#allocation8 + $0x28] sm:$0xff]  }
 0x119   :  { %2388 = vmatprep.subr.bf16.mxu0 %v2802_v0 }
 0x11c   :  { %2336 = vmatmul.mubr.msk.bf16.vlgmr.msra.gmra.mrb[4].mxu1 %vm1307_vm0, %v2848_v24  ;;  %2389 = vmatpush3.bf16.msra.mxu0 %v2803_v33  ;;  %v2824_v24 = vld [vmem:[#allocation8] sm:$0xff]  }
 0x11d   :  { %2403 = vmatpush3.bf16.msra.mxu1 %v2801_v32  ;;  %2390 = vmatprep.subr.bf16.mxu0 %v2806_v36  ;;  %v2831_v32 = vld [vmem:[#allocation8 + $0x38] sm:$0xff]  }
 0x11e   :  { %2404 = vmatprep.subr.bf16.mxu1 %v2804_v34 }
 0x120   :  { %2391 = vmatpush3.bf16.msra.mxu0 %v2807_v37  ;;  %v2337_v37 = vld [vmem:[%s3114_s4] ss:$0 sm:$0xff]  ;;  %s2978_s4 = smov [#allocation10]  }
 0x121   :  { %2405 = vmatpush3.bf16.msra.mxu1 %v2805_v35  ;;  %2392 = vmatprep.subr.bf16.mxu0 %v2810_v40  ;;  %s2121_s30 = sshll.u32 %s2978_s4, 4  ;;  %s2122_s30 = int_to_ptr.vmem [resolvable:$true] %s2121_s30 }
 0x122   :  { %2406 = vmatprep.subr.bf16.mxu1 %v2808_v38  ;;  %s2937_s8 = scalar_lea.vmem %s2122_s30, 128  ;;  %p2942_p5 = scmp.lt.s32.totalorder %s2122_s30, %s2122_s30 }
 0x123   :  { %v3083_v25 = vpop.f32.mrb[0].mxu1  ;;  %p2938_p4 = scmp.ne.s32.totalorder %s2122_s30, %s2937_s8  ;;  %p2943_p6 = scmp.lt.s32.totalorder %s2937_s8, %s2937_s8 }
 0x124   :  { %v3085_v26 = vpop.f32.mrb[1].mxu1  ;;  %2393 = vmatpush3.bf16.msra.mxu0 %v2811_v41 }
 0x125   :  { %v1472_v27 = vpop.f32.mrb[2].mxu1  ;;  %2407 = vmatpush3.bf16.msra.mxu1 %v2809_v39  ;;  %2394 = vmatprep.subr.bf16.mxu0 %v2814_v44  ;;  %p2944_p7 = por %p2943_p6, %p2942_p5 }
 0x126   :  { %v1473_v28 = vpop.f32.mrb[3].mxu1  ;;  %2408 = vmatprep.subr.bf16.mxu1 %v2812_v42  ;;  %v2826_v27 = vld [vmem:[#allocation8 + $0x10] sm:$0xff]  }
 0x127   :  { %v2827_v28 = vld [vmem:[#allocation8 + $0x18] sm:$0xff]   ;;  %p2945_p8 = pnand %p2944_p7, %p2938_p4 }
 0x128   :  { %2395 = vmatpush3.bf16.msra.mxu0 %v2815_v45 }
 0x129   :  { %2409 = vmatpush3.bf16.msra.mxu1 %v2813_v43 }
 0x12a   :  { %2410 = vmatprep.subr.bf16.mxu1 %v2816_v46 }
 0x12d   :  { %2411 = vmatpush3.bf16.msra.mxu1 %v2817_v47 }
 0x12e   :  { %2412 = vmatprep.subr.bf16.mxu1 %v2818_v48 }
 0x131   :  { %2413 = vmatpush3.bf16.msra.mxu1 %v2819_v49 }
 0x132   :  { %2414 = vmatprep.subr.bf16.mxu1 %v2820_v50  ;;  %v2371_v50 = vld [vmem:[%s3116_s6] ss:$0 sm:$0xff] }
 0x135   :  { %2415 = vmatpush3.bf16.msra.mxu1 %v2821_v51 }
 0x136   :  { %2416 = vmatprep.subr.bf16.mxu1 %v2822_v52 }
 0x139   :  { %2417 = vmatpush3.bf16.msra.mxu1 %v2823_v53 }
 0x1de   :  { %v1427_v61 = vpop.f32.mrb[0].mxu0 }
 0x1df   :  { %v2453_v62 = vadd.f32 %v1427_v61, %v286_v59  ;;  %v1429_v63 = vpop.f32.mrb[1].mxu0 }
 0x1e0   :  { %v2455_v1 = vadd.f32 %v1429_v63, %v290_v60  ;;  %v1431_v2 = vpop.f32.mrb[2].mxu0 }
 0x1e1   :  { %v2454_v3 = vadd.f32 %v2453_v62, %v3083_v25  ;;  %v1432_v4 = vpop.f32.mrb[3].mxu0  ;;  %v2976_v25 = vmov 0.0  }
 0x1e2   :  { %v2456_v5 = vadd.f32 %v2455_v1, %v3085_v26  ;;  %2433 = vmatprep.subr.bf16.mxu0 %v2976_v25  ;;  %v2825_v26 = vld [vmem:[#allocation8 + $0x8] sm:$0xff]  }
 0x1e3   :  { %2832 = vtanh.f32 %v2454_v3 }
 0x1e4   :  { %2834 = vtanh.f32 %v2456_v5 }
 0x1ed   :  { %v2833_v10 = vpop.eup %2832 }
 0x1ee   :  { %v2835_v11 = vpop.eup %2834  ;;  %v1643_v17 = vpack.c.bf16 %v2833_v10, %v2833_v10 }
 0x1ef   :  { %v1632_v12 = vpop.f32.mrb[4].mxu1  ;;  %v1644_v15 = vpack.c.bf16 %v2835_v11, %v2835_v11 }
 0x1f0   :  { %v2457_v13 = vadd.f32 %v1632_v12, %v294_v8  ;;  %v1634_v14 = vpop.f32.mrb[5].mxu1 }
 0x1f1   :  { %v2458_v18 = vadd.f32 %v1634_v14, %v298_v9  ;;  %v1636_v19 = vpop.f32.mrb[6].mxu1  ;;  %1942 = vmatprep.mubr.bf16.mxu0 %v1644_v15 }
 0x1f2   :  { %2836 = vtanh.f32 %v2457_v13  ;;  %v1637_v20 = vpop.f32.mrb[7].mxu1  ;;  %1943 = vmatmul.mubr.bf16.vlgmr.msra.gmra.mrb[4].mxu0 %v1643_v17 }
 0x1f3   :  { %2838 = vtanh.f32 %v2458_v18  ;;  %2434 = vmatpush3.bf16.msra.mxu0 %v2824_v24  ;;  %2449 = vmatprep.mubr.msk.bf16.mxu0 %vm2977_vm1, %v2976_v25 }
 0x1f4   :  { %2435 = vmatprep.subr.bf16.mxu0 %v2976_v25 }
 0x1f7   :  { %2436 = vmatpush3.bf16.msra.mxu0 %v2825_v26 }
 0x1f8   :  { %2437 = vmatprep.subr.bf16.mxu0 %v2976_v25 }
 0x1fb   :  { %2438 = vmatpush3.bf16.msra.mxu0 %v2826_v27 }
 0x1fc   :  { %v2837_v21 = vpop.eup %2836  ;;  %2439 = vmatprep.subr.bf16.mxu0 %v2976_v25 }
 0x1fd   :  { %v2839_v22 = vpop.eup %2838  ;;  %v1645_v16 = vpack.c.bf16 %v2837_v21, %v2837_v21 }
 0x1fe   :  { %v1646_v23 = vpack.c.bf16 %v2839_v22, %v2839_v22 }
 0x1ff   :  { %2440 = vmatpush3.bf16.msra.mxu0 %v2827_v28 }
 0x200   :  { %1982 = vmatprep.mubr.bf16.mxu1 %v1646_v23  ;;  %2441 = vmatprep.subr.bf16.mxu0 %v2976_v25 }
 0x201   :  { %1983 = vmatmul.mubr.bf16.vlgmr.msra.gmra.mrb[8].mxu1 %v1645_v16 }
 0x203   :  { %2442 = vmatpush3.bf16.msra.mxu0 %v2828_v29 }
 0x204   :  { %2443 = vmatprep.subr.bf16.mxu0 %v2976_v25 }
 0x207   :  { %2444 = vmatpush3.bf16.msra.mxu0 %v2829_v30 }
 0x208   :  { %2445 = vmatprep.subr.bf16.mxu0 %v2976_v25 }
 0x20b   :  { %2446 = vmatpush3.bf16.msra.mxu0 %v2830_v31 }
 0x20c   :  { %2447 = vmatprep.subr.bf16.mxu0 %v2976_v25 }
 0x20f   :  { %2448 = vmatpush3.bf16.msra.mxu0 %v2831_v32 }
 0x2c5   :  { %v2396_v0 = vpop.f32.mrb[4].mxu0 }
 0x2c6   :  { %v2397_v33 = vpop.f32.mrb[5].mxu0 }
 0x2c7   :  { %v2398_v34 = vadd.f32 %v2397_v33, %v2396_v0  ;;  %v2399_v35 = vpop.f32.mrb[6].mxu0 }
 0x2c8   :  { %v2400_v36 = vpop.f32.mrb[7].mxu0 }
 0x2c9   :  { %v1945_v40 = vadd.f32 %v2398_v34, %v2337_v37 }
 0x2d4   :  { %v2418_v38 = vpop.f32.mrb[8].mxu1 }
 0x2d5   :  { %v2419_v39 = vpop.f32.mrb[9].mxu1 }
 0x2d6   :  { %v2420_v41 = vadd.f32 %v2419_v39, %v2418_v38  ;;  %v2421_v42 = vpop.f32.mrb[10].mxu1 }
 0x2d7   :  { %v2422_v43 = vpop.f32.mrb[11].mxu1 }
 0x2d8   :  { %v1985_v44 = vadd.f32 %v2420_v41, %v1945_v40 }
 0x2da   :  { %v2370_v45 = vmul.f32 -1.442695, %v1985_v44 }
 0x2dc   :  { %2840 = vpow2.f32 %v2370_v45 }
 0x2e6   :  { %v2841_v46 = vpop.eup %2840 }
 0x2e7   :  { %v1993_v47 = vadd.f32 1.0, %v2841_v46 }
 0x2e9   :  { %2842 = vrcp.f32 %v1993_v47 }
 0x2f3   :  { %v2843_v48 = vpop.eup %2842 }
 0x2f4   :  { %v1996_v49 = vpack.c.bf16 %v2843_v48, %v2843_v48 }
 0x2f6   :  { %2450 = vmatmul.mubr.bf16.vlgmr.msra.gmra.mrb[8].mxu0 %v1996_v49 }
 0x3c9   :  { %v2102_v51 = vpop.f32.mrb[8].mxu0 }
 0x3ca   :  { %v2103_v52 = vadd.f32 %v2371_v50, %v2102_v51  ;;  %v2451_v53 = vpop.f32.mrb[9].mxu0 }
 0x3cb   :  { %v2105_v54 = vpop.f32.mrb[10].mxu0 }
 0x3cc   :  { %v2108_v55 = vmul.f32 1.442695, %v2103_v52  ;;  %v2452_v56 = vpop.f32.mrb[11].mxu0 }
 0x3ce   :  { %2844 = vpow2.f32 %v2108_v55 }
 0x3d8   :  { %v2845_v57 = vpop.eup %2844 }
 0x3d9   :  { %2110 = vadd.xlane.f32.xlu0 %v2845_v57 }
 0x466   :  { %v2111_v58 = vpop.xlane.xlu0 %2110 }
 0x467   :  { %2846 = vrcp.f32 %v2111_v58 }
 0x471   :  { %v2847_v59 = vpop.eup %2846 }
 0x472   :  { %v2113_v60 = vmul.f32 %v2847_v59, %v2845_v57 }
 0x474   :  { %2114 = vst [vmem:[#allocation10] sm:$0xff] %v2113_v60 }
 0x475   :  { %2948 = shalt.err (!%p2945_p8)
}
 0x476   :  { %s2949_s10 = scalar_lea.hbm %s3117_s7, 128 }
 0x477   :  { %p2950_p9 = scmp.ne.s32.totalorder %s3117_s7, %s2949_s10  ;;  %p2953_p10 = scmp.lt.u32.totalorder %s2949_s10, %s3117_s7 }
 0x479   :  { %p2955_p11 = pnand %p2953_p10, %p2950_p9 }
 0x47b   :  { %2958 = shalt.err (!%p2955_p11)
}
 0x47c   :  { %2124 = dma.vmem_to_hbm [thread:$0]  %s2122_s30, 128, %s3117_s7, [#allocation4]  }
 0x47d   :  { %2965 = dma.done.wait [#allocation4], 128  }
 0x47e   :  { %2966 = vsyncadd [#allocation4], 4294967168 }
 0x47f   :  { %2128 = vsyncpa [#allocation3], 1 }
 0x480   :  { %2129 = vsyncpa [#allocation6], 1 }
 0x481   :  { %2130 = vsyncpa [#allocation9], 1 }
 0x482   :  { %2131 = vsyncpa [#allocation4], 1 }

</bundles_post_ra>
